<compile_context>
chip_gen: v5e
topology: v5e:2x2
jax: 0.10.0
libtpu: 0.0.40
codegen_flags: <defaults>
</compile_context>

<pallas_src>
import functools
import math

import jax
import jax.numpy as jnp
from jax.experimental import pallas as pl
from jax.experimental.pallas import tpu as pltpu

# Matmul-input dtype for the MXU path.  Accumulation is always f32
# (preferred_element_type); softmax / LayerNorm math stays f32 (v5e has no bf16 VPU/EUP).
COMPUTE_DTYPE = jnp.bfloat16


# ----------------------------------------------------------------------------
# Helpers
# ----------------------------------------------------------------------------
def _pick_tile(dim, target, align):
    """Largest clean tile <= target dividing dim (halving down to `align`);
    small dims use the full-dim exemption of the (8,128) rule."""
    if dim <= target:
        return dim
    t = target
    while t >= align:
        if dim % t == 0:
            return t
        t //= 2
    return dim  # TODO(synk): masked epilogue instead of a full-dim fallback.


# ----------------------------------------------------------------------------
# Kernel 1: tiled linear  y = x @ W + b  (W stored as (K, N)), optional fused ReLU.
# Grid = (M//tm, N//tn, K//tk), f32 accumulator scratch, K innermost ("arbitrary").
# bf16 MXU inputs, f32 accumulation; bias/ReLU applied once on the last K step.
# ----------------------------------------------------------------------------
def _linear_kernel(x_ref, w_ref, b_ref, o_ref, acc_ref, *, activation):
    @pl.when(pl.program_id(2) == 0)
    def _():
        acc_ref[...] = jnp.zeros_like(acc_ref)

    acc_ref[...] += jnp.dot(
        x_ref[...].astype(COMPUTE_DTYPE),
        w_ref[...].astype(COMPUTE_DTYPE),
        preferred_element_type=jnp.float32,
    )

    @pl.when(pl.program_id(2) == pl.num_programs(2) - 1)
    def _():
        y = acc_ref[...] + b_ref[...]
        if activation == "relu":
            y = jnp.maximum(y, 0.0)
        o_ref[...] = y.astype(o_ref.dtype)


def linear(x, w, b, activation=None, out_dtype=None, tm=256, tn=256, tk=1024):
    # bf16 weight stream -> large K tiles amortize the ~0.35 us per-grid-step cost.
    # On v5e a third weight buffer (pipeline_mode=pl.Buffered(3)) hides more of the
    # weight DMA; omitted here to keep the kernel portable.
    M, K = x.shape
    Kw, N = w.shape
    assert K == Kw
    out_dtype = out_dtype or x.dtype
    tm = _pick_tile(M, tm, 8)
    tn = _pick_tile(N, tn, 128)
    tk = _pick_tile(K, tk, 128)
    grid = (pl.cdiv(M, tm), pl.cdiv(N, tn), pl.cdiv(K, tk))

    return pl.pallas_call(
        functools.partial(_linear_kernel, activation=activation),
        out_shape=jax.ShapeDtypeStruct((M, N), out_dtype),
        grid_spec=pltpu.PrefetchScalarGridSpec(
            num_scalar_prefetch=0,
            grid=grid,
            in_specs=[
                pl.BlockSpec((tm, tk), lambda i, j, k: (i, k)),
                pl.BlockSpec((tk, tn), lambda i, j, k: (k, j)),
                pl.BlockSpec((1, tn), lambda i, j, k: (0, j)),
            ],
            out_specs=pl.BlockSpec((tm, tn), lambda i, j, k: (i, j)),
            scratch_shapes=[pltpu.VMEM((tm, tn), jnp.float32)],
        ),
        compiler_params=pltpu.CompilerParams(
            dimension_semantics=("parallel", "parallel", "arbitrary")),
    )(x, w, b.reshape(1, N))


# ----------------------------------------------------------------------------
# Kernel 2: tiled linear with fused residual-add + LayerNorm epilogue.
#   y = LayerNorm(residual + x @ W + b) * gamma + beta      (eps = 1e-6)
# The N (feature) dim is kept whole so the epilogue sees full rows for mean/var.
# Grid = (M//tm, K//tk), K innermost, f32 accumulator scratch; the residual /
# gamma / beta / output blocks keep the same block index across K so they stay
# resident in VMEM (no re-DMA per K step).
# ----------------------------------------------------------------------------
def _linear_add_ln_kernel(x_ref, w_ref, b_ref, res_ref, g_ref, beta_ref,
                          o_ref, acc_ref, *, eps):
    @pl.when(pl.program_id(1) == 0)
    def _():
        acc_ref[...] = jnp.zeros_like(acc_ref)

    acc_ref[...] += jnp.dot(
        x_ref[...].astype(COMPUTE_DTYPE),
        w_ref[...].astype(COMPUTE_DTYPE),
        preferred_element_type=jnp.float32,
    )

    @pl.when(pl.program_id(1) == pl.num_programs(1) - 1)
    def _():
        z = acc_ref[...] + b_ref[...] + res_ref[...].astype(jnp.float32)
        mean = jnp.mean(z, axis=-1, keepdims=True)
        zc = z - mean
        var = jnp.mean(zc * zc, axis=-1, keepdims=True)
        inv = jax.lax.rsqrt(var + eps)
        o_ref[...] = ((zc * inv) * g_ref[...] + beta_ref[...]).astype(o_ref.dtype)


def linear_add_ln(x, w, b, residual, gamma, beta, eps=1e-6, out_dtype=None,
                  tm=256, tk=512):
    M, K = x.shape
    Kw, N = w.shape
    assert K == Kw and residual.shape == (M, N)
    out_dtype = out_dtype or residual.dtype
    tm = _pick_tile(M, tm, 8)
    tk = _pick_tile(K, tk, 128)
    grid = (pl.cdiv(M, tm), pl.cdiv(K, tk))

    return pl.pallas_call(
        functools.partial(_linear_add_ln_kernel, eps=eps),
        out_shape=jax.ShapeDtypeStruct((M, N), out_dtype),
        grid_spec=pltpu.PrefetchScalarGridSpec(
            num_scalar_prefetch=0,
            grid=grid,
            in_specs=[
                pl.BlockSpec((tm, tk), lambda i, k: (i, k)),
                pl.BlockSpec((tk, N), lambda i, k: (k, 0)),
                pl.BlockSpec((1, N), lambda i, k: (0, 0)),
                pl.BlockSpec((tm, N), lambda i, k: (i, 0)),
                pl.BlockSpec((1, N), lambda i, k: (0, 0)),
                pl.BlockSpec((1, N), lambda i, k: (0, 0)),
            ],
            out_specs=pl.BlockSpec((tm, N), lambda i, k: (i, 0)),
            scratch_shapes=[pltpu.VMEM((tm, N), jnp.float32)],
        ),
        compiler_params=pltpu.CompilerParams(
            dimension_semantics=("parallel", "arbitrary")),
    )(x, w, b.reshape(1, N), residual, gamma.reshape(1, N), beta.reshape(1, N))


# ----------------------------------------------------------------------------
# Kernel 3: scaled dot-product attention, one (batch, head) pair per grid step.
# qkv arrives head-major as (3, B, H, S, d_k): per grid point the block is
# (3, 1, 1, S, d_k), so q/k/v head slices start at lane 0 (no mid-lane cuts).
# The 1/sqrt(d_k) scale is folded into the Q projection weights; the additive
# mask bias is computed in-kernel from the raw 0/1 mask.
# ----------------------------------------------------------------------------
def _attention_kernel(qkv_ref, mask_ref, o_ref, aw_ref):
    q = qkv_ref[0, 0, 0]                              # (S, d_k), COMPUTE_DTYPE
    k = qkv_ref[1, 0, 0]
    v = qkv_ref[2, 0, 0]
    bias = (mask_ref[0] - 1.0) * 1e9                  # 0 attend / -1e9 masked, f32

    # contract on the last dim of both (no explicit K transpose on the MXU path)
    s = jax.lax.dot_general(q, k, (((1,), (1,)), ((), ())),
                            preferred_element_type=jnp.float32)
    s = s + bias

    m = jnp.max(s, axis=-1, keepdims=True)
    p = jnp.exp(s - m)                                # f32 softmax math
    denom = jnp.sum(p, axis=-1, keepdims=True)
    weights = p / denom

    aw_ref[0, 0] = weights                            # lane-dense (S, S) store
    o_ref[0, 0] = jnp.dot(weights.astype(v.dtype), v,
                          preferred_element_type=jnp.float32).astype(o_ref.dtype)


def attention(qkv5, masks):
    three, B, H, S, d_k = qkv5.shape
    assert three == 3
    out, attn_w = pl.pallas_call(
        _attention_kernel,
        out_shape=(
            jax.ShapeDtypeStruct((B, H, S, d_k), qkv5.dtype),
            jax.ShapeDtypeStruct((B, H, S, S), jnp.float32),
        ),
        grid=(B, H),
        in_specs=[
            pl.BlockSpec((3, 1, 1, S, d_k), lambda b, h: (0, b, h, 0, 0)),
            pl.BlockSpec((1, S, S), lambda b, h: (b, 0, 0)),
        ],
        out_specs=(
            pl.BlockSpec((1, 1, S, d_k), lambda b, h: (b, h, 0, 0)),
            pl.BlockSpec((1, 1, S, S), lambda b, h: (b, h, 0, 0)),
        ),
        compiler_params=pltpu.CompilerParams(
            dimension_semantics=("parallel", "parallel")),
    )(qkv5, masks)
    return out, attn_w


# ----------------------------------------------------------------------------
# Parameter preparation: pre-transpose weights to (K, N), fuse QKV, fold the
# 1/sqrt(d_k) attention scale into the Q projection, cast weights to bf16 once.
# ----------------------------------------------------------------------------
def prepare_params(raw, n_heads, compute_dtype=COMPUTE_DTYPE):
    d_model = raw["wq"].shape[0]
    d_k = d_model // n_heads
    scale = 1.0 / math.sqrt(d_k)
    w_qkv = jnp.concatenate(
        [raw["wq"].T * scale, raw["wk"].T, raw["wv"].T], axis=1)   # (d_model, 3*d_model)
    b_qkv = jnp.concatenate([raw["bq"] * scale, raw["bk"], raw["bv"]])
    cast = lambda w: w.astype(compute_dtype)
    return dict(
        w_qkv=cast(w_qkv), b_qkv=b_qkv,
        w_o=cast(raw["wo"].T), b_o=raw["bo"],
        ln1_g=raw["ln1_g"], ln1_b=raw["ln1_b"],
        w_ff1=cast(raw["w1"].T), b_ff1=raw["b1"],
        w_ff2=cast(raw["w2"].T), b_ff2=raw["b2"],
        ln2_g=raw["ln2_g"], ln2_b=raw["ln2_b"],
    )


# ----------------------------------------------------------------------------
# Full SingleEncoderLayer forward (dropout = identity in eval mode)
# ----------------------------------------------------------------------------
def single_encoder_layer(inputs, attention_masks, params, n_heads):
    B, S, d_model = inputs.shape
    d_k = d_model // n_heads
    x2d = inputs.reshape(B * S, d_model)

    # fused Q/K/V projection: one GEMM, x read from HBM once; output in bf16
    qkv = linear(x2d, params["w_qkv"], params["b_qkv"], out_dtype=COMPUTE_DTYPE)

    # head-major relayout (cheap XLA transpose of the bf16 qkv) so the attention
    # grid can be (B, H) with lane-dense per-head blocks.
    qkv5 = qkv.reshape(B, S, 3, n_heads, d_k).transpose(2, 0, 3, 1, 4)  # (3,B,H,S,dk)

    attn_bhsd, attn_weights = attention(qkv5, attention_masks)          # (B,H,S,dk)
    attn_flat = attn_bhsd.transpose(0, 2, 1, 3).reshape(B * S, d_model)

    # output projection + dropout_1 (identity in eval) + residual + LayerNorm 1,
    # fused into one GEMM epilogue
    h1 = linear_add_ln(attn_flat, params["w_o"], params["b_o"], residual=x2d,
                       gamma=params["ln1_g"], beta=params["ln1_b"],
                       out_dtype=inputs.dtype)

    # FFN: linear+ReLU fused in the GEMM epilogue, then
    # linear + dropout_2 (identity) + residual + LayerNorm 2 fused
    ff = linear(h1, params["w_ff1"], params["b_ff1"], activation="relu",
                out_dtype=COMPUTE_DTYPE)
    h2 = linear_add_ln(ff, params["w_ff2"], params["b_ff2"], residual=h1,
                       gamma=params["ln2_g"], beta=params["ln2_b"],
                       out_dtype=inputs.dtype)

    return h2.reshape(B, S, d_model), attn_weights


# ----------------------------------------------------------------------------
# Pure-JAX f32 reference (mirrors the PyTorch module exactly)
# ----------------------------------------------------------------------------
def _reference(x, mask, raw, n_heads, eps=1e-6):
    B, S, d_model = x.shape
    d_k = d_model // n_heads
    lin = lambda t, w, b: t @ w.T + b

    qh = lin(x, raw["wq"], raw["bq"]).reshape(B, S, n_heads, d_k).transpose(0, 2, 1, 3)
    kh = lin(x, raw["wk"], raw["bk"]).reshape(B, S, n_heads, d_k).transpose(0, 2, 1, 3)
    vh = lin(x, raw["wv"], raw["bv"]).reshape(B, S, n_heads, d_k).transpose(0, 2, 1, 3)
    scores = jnp.einsum("bhqd,bhkd->bhqk", qh, kh) / math.sqrt(d_k)
    scores = jnp.where(mask[:, None] == 0, -1e9, scores)
    w = jax.nn.softmax(scores, axis=-1)
    attn = jnp.einsum("bhqk,bhkd->bhqd", w, vh).transpose(0, 2, 1, 3).reshape(B, S, d_model)
    attn = lin(attn, raw["wo"], raw["bo"])

    def ln(t, g, b):
        mu = t.mean(-1, keepdims=True)
        var = ((t - mu) ** 2).mean(-1, keepdims=True)
        return (t - mu) / jnp.sqrt(var + eps) * g + b

    h1 = ln(x + attn, raw["ln1_g"], raw["ln1_b"])
    ff = jnp.maximum(lin(h1, raw["w1"], raw["b1"]), 0.0)
    ff = lin(ff, raw["w2"], raw["b2"])
    h2 = ln(h1 + ff, raw["ln2_g"], raw["ln2_b"])
    return h2, w


if __name__ == "__main__":
    B, S, d_model, n_heads, d_hidden = 2, 8, 32, 4, 64

    key = jax.random.PRNGKey(0)
    ks = jax.random.split(key, 18)

    def init_linear(kw, kb, out_dim, in_dim):
        lim = 1.0 / math.sqrt(in_dim)
        w = jax.random.uniform(kw, (out_dim, in_dim), jnp.float32, -lim, lim)
        b = jax.random.uniform(kb, (out_dim,), jnp.float32, -lim, lim)
        return w, b

    wq, bq = init_linear(ks[0], ks[1], d_model, d_model)
    wk, bk = init_linear(ks[2], ks[3], d_model, d_model)
    wv, bv = init_linear(ks[4], ks[5], d_model, d_model)
    wo, bo = init_linear(ks[6], ks[7], d_model, d_model)
    w1, b1 = init_linear(ks[8], ks[9], d_hidden, d_model)
    w2, b2 = init_linear(ks[10], ks[11], d_model, d_hidden)

    raw = dict(
        wq=wq, bq=bq, wk=wk, bk=bk, wv=wv, bv=bv, wo=wo, bo=bo,
        w1=w1, b1=b1, w2=w2, b2=b2,
        ln1_g=1.0 + 0.1 * jax.random.normal(ks[12], (d_model,), jnp.float32),
        ln1_b=0.1 * jax.random.normal(ks[13], (d_model,), jnp.float32),
        ln2_g=1.0 + 0.1 * jax.random.normal(ks[14], (d_model,), jnp.float32),
        ln2_b=0.1 * jax.random.normal(ks[15], (d_model,), jnp.float32),
    )
    params = prepare_params(raw, n_heads)

    inputs = jax.random.normal(ks[16], (B, S, d_model), jnp.float32)
    # causal mask (1 = attend), matching masked_fill(mask == 0, -1e9) semantics
    attention_masks = jnp.tril(jnp.ones((S, S), jnp.float32))[None].repeat(B, axis=0)

    out, attn_weights = single_encoder_layer(inputs, attention_masks, params, n_heads)
    jax.block_until_ready((out, attn_weights))

    ref_out, ref_w = _reference(inputs, attention_masks, raw, n_heads)
    assert out.shape == (B, S, d_model)
    assert attn_weights.shape == (B, n_heads, S, S)
    # tolerances sized for bf16 MXU inputs with f32 accumulation
    assert jnp.allclose(attn_weights, ref_w, atol=2.5e-2, rtol=2.5e-2), \
        float(jnp.max(jnp.abs(attn_weights - ref_w)))
    assert jnp.allclose(out, ref_out, atol=6e-2, rtol=6e-2), \
        float(jnp.max(jnp.abs(out - ref_out)))

    print("KERNEL_OK")
</pallas_src>

<mosaic_0001>
module attributes {stable_mosaic.version = 11 : i64} {
  func.func @_linear_kernel(%arg0: i32, %arg1: i32, %arg2: i32, %arg3: memref<16x32xf32, #tpu.memory_space<vmem>>, %arg4: memref<32x96xbf16, #tpu.memory_space<vmem>>, %arg5: memref<1x96xf32, #tpu.memory_space<vmem>>, %arg6: memref<16x96xbf16, #tpu.memory_space<vmem>>, %arg7: memref<16x96xf32, #tpu.memory_space<vmem>>) attributes {dimension_semantics = [#tpu.dimension_semantics<parallel>, #tpu.dimension_semantics<parallel>, #tpu.dimension_semantics<arbitrary>], iteration_bounds = array<i64: 1, 1, 1>, scalar_prefetch = 0 : i64, scratch_operands = 1 : i64, tpu.core_type = #tpu.core_type<tc>, window_params = [{transform_indices = @transform_0, window_bounds = array<i64: 16, 32>}, {transform_indices = @transform_1, window_bounds = array<i64: 32, 96>}, {transform_indices = @transform_2, window_bounds = array<i64: 1, 96>}, {transform_indices = @transform_3, window_bounds = array<i64: 16, 96>}]} {
    %c0_i32 = arith.constant 0 : i32
    %0 = arith.cmpi eq, %arg2, %c0_i32 : i32
    %1 = arith.extui %0 : i1 to i32
    %c0_i32_0 = arith.constant 0 : i32
    %2 = arith.cmpi ne, %1, %c0_i32_0 : i32
    scf.if %2 {
      %cst_10 = arith.constant 0.000000e+00 : f32
      %13 = vector.broadcast %cst_10 : f32 to vector<16x96xf32>
      %c0_11 = arith.constant 0 : index
      %c0_12 = arith.constant 0 : index
      %14 = vector.load %arg7[%c0_11, %c0_12] : memref<16x96xf32, #tpu.memory_space<vmem>>, vector<16x96xf32>
      tpu.vector_store %arg7[%c0_11, %c0_12], %13 {strides = array<i32>} : memref<16x96xf32, #tpu.memory_space<vmem>>, vector<16x96xf32>,
    } else {
    }
    %c0 = arith.constant 0 : index
    %c0_1 = arith.constant 0 : index
    %3 = vector.load %arg7[%c0, %c0_1] : memref<16x96xf32, #tpu.memory_space<vmem>>, vector<16x96xf32>
    %c0_2 = arith.constant 0 : index
    %c0_3 = arith.constant 0 : index
    %4 = vector.load %arg3[%c0_2, %c0_3] : memref<16x32xf32, #tpu.memory_space<vmem>>, vector<16x32xf32>
    %5 = arith.truncf %4 : vector<16x32xf32> to vector<16x32xbf16>
    %c0_4 = arith.constant 0 : index
    %c0_5 = arith.constant 0 : index
    %6 = vector.load %arg4[%c0_4, %c0_5] : memref<32x96xbf16, #tpu.memory_space<vmem>>, vector<32x96xbf16>
    %cst = arith.constant dense<0.000000e+00> : vector<16x96xf32>
    %7 = tpu.matmul %5, %6, %cst {dimension_numbers = #tpu.dot_dimension_numbers<[1], [0], [0], [1], [0, 0, 1, 1], [], []>} : vector<16x32xbf16>, vector<32x96xbf16>, vector<16x96xf32> -> vector<16x96xf32>
    %8 = arith.addf %3, %7 : vector<16x96xf32>
    %c0_6 = arith.constant 0 : index
    %c0_7 = arith.constant 0 : index
    %9 = vector.load %arg7[%c0_6, %c0_7] : memref<16x96xf32, #tpu.memory_space<vmem>>, vector<16x96xf32>
    tpu.vector_store %arg7[%c0_6, %c0_7], %8 {strides = array<i32>} : memref<16x96xf32, #tpu.memory_space<vmem>>, vector<16x96xf32>,
    %c0_i32_8 = arith.constant 0 : i32
    %10 = arith.cmpi eq, %arg2, %c0_i32_8 : i32
    %11 = arith.extui %10 : i1 to i32
    %c0_i32_9 = arith.constant 0 : i32
    %12 = arith.cmpi ne, %11, %c0_i32_9 : i32
    scf.if %12 {
      %c0_10 = arith.constant 0 : index
      %c0_11 = arith.constant 0 : index
      %13 = vector.load %arg7[%c0_10, %c0_11] : memref<16x96xf32, #tpu.memory_space<vmem>>, vector<16x96xf32>
      %c0_12 = arith.constant 0 : index
      %c0_13 = arith.constant 0 : index
      %14 = vector.load %arg5[%c0_12, %c0_13] : memref<1x96xf32, #tpu.memory_space<vmem>>, vector<1x96xf32>
      %15 = vector.broadcast %14 : vector<1x96xf32> to vector<16x96xf32>
      %16 = arith.addf %13, %15 : vector<16x96xf32>
      %17 = arith.truncf %16 : vector<16x96xf32> to vector<16x96xbf16>
      %c0_14 = arith.constant 0 : index
      %c0_15 = arith.constant 0 : index
      %18 = vector.load %arg6[%c0_14, %c0_15] : memref<16x96xbf16, #tpu.memory_space<vmem>>, vector<16x96xbf16>
      tpu.vector_store %arg6[%c0_14, %c0_15], %17 {strides = array<i32>} : memref<16x96xbf16, #tpu.memory_space<vmem>>, vector<16x96xbf16>,
    } else {
    }
    return
  }
  func.func @transform_0(%arg0: i32, %arg1: i32, %arg2: i32) -> (i32, i32) {
    %c0_i32 = arith.constant 0 : i32
    return %arg0, %arg2 : i32, i32
  }
  func.func @transform_1(%arg0: i32, %arg1: i32, %arg2: i32) -> (i32, i32) {
    %c0_i32 = arith.constant 0 : i32
    return %arg2, %arg1 : i32, i32
  }
  func.func @transform_2(%arg0: i32, %arg1: i32, %arg2: i32) -> (i32, i32) {
    %c0_i32 = arith.constant 0 : i32
    %c0_i32_0 = arith.constant 0 : i32
    return %c0_i32, %arg1 : i32, i32
  }
  func.func @transform_3(%arg0: i32, %arg1: i32, %arg2: i32) -> (i32, i32) {
    %c0_i32 = arith.constant 0 : i32
    return %arg0, %arg1 : i32, i32
  }
}

</mosaic_0001>

<bundles_post_ra>
// kernel: tpu_custom_call.1
= control target key start
LH: loop header
LB: loop body
LE: loop exit
PB: predicated region body
PF: predicated region fallthrough
CT: control target
= control target key end

     0   :  { %8 = vsyncpa [#allocation4], 0  ;;  %s283_s0 = inlined_call_operand.hbm [shape: f32[16,32], index: 0, kind: input, shape index: {}]   ;;  %s284_s1 = inlined_call_operand.hbm [shape: bf16[32,96], index: 1, kind: input, shape index: {}]   ;;  %s285_s2 = inlined_call_operand.vmem [shape: f32[1,96], index: 2, kind: input, shape index: {}]   ;;  %s286_s3 = inlined_call_operand.hbm [shape: bf16[16,96], index: 3, kind: output, shape index: {}]  }
   0x1   :  { %9 = vsyncpa [#allocation7], 0 }
   0x2   :  { %10 = vsyncpa [#allocation5], 0  ;;  %s15_s14 = sshll.u32 %s283_s0, 4  ;;  %s233_s15 = smov [#allocation3]   ;;  %s16_s14 = int_to_ptr.hbm [resolvable:$true] %s15_s14 }
   0x3   :  { %s17_s16 = sshll.u32 %s233_s15, 4  ;;  %s28_s19 = sshll.u32 %s284_s1, 4  ;;  %s18_s16 = int_to_ptr.vmem [resolvable:$true] %s17_s16  ;;  %s29_s19 = int_to_ptr.hbm [resolvable:$true] %s28_s19 }
   0x4   :  { %s234_s20 = smov 128   ;;  %s235_s21 = smov 8  }
   0x5   :  { %23 = dma.hbm_to_vmem [thread:$0]  %s16_s14, 256, %s18_s16, [#allocation4], %s234_s20, %s234_s20, %s235_s21  }
   0x6   :  { %s236_s22 = smov [#allocation6]   ;;  %s237_s24 = smov 64  }
   0x7   :  { %s30_s23 = sshll.u32 %s236_s22, 4  ;;  %s238_s25 = smov 4   ;;  %s31_s23 = int_to_ptr.vmem [resolvable:$true] %s30_s23 }
   0x8   :  { %36 = dma.hbm_to_vmem [thread:$0]  %s29_s19, 256, %s31_s23, [#allocation7], %s237_s24, %s237_s24, %s238_s25  }
   0x9   :  { %227 = dma.done.wait [#allocation4], 256  }
   0xa   :  { %228 = vsyncadd [#allocation4], 4294967040 }
   0xb   :  { %229 = dma.done.wait [#allocation7], 256  }
   0xc   :  { %230 = vsyncadd [#allocation7], 4294967040  ;;  %vm52_vm0 = vcmask 785408   ;;  %v239_v0 = vmov 0.0   ;;  %v145_v1 = vld [vmem:[#allocation6 + $0x8] sm:$0xff]  ;;  %v144_v2 = vld [vmem:[#allocation6] sm:$0xff] }
   0xd   :  { %53 = vst.msk [vmem:[#allocation2] sm:$0xff] %vm52_vm0, %v239_v0  ;;  %86 = vmatpush.bf16.msra.mxu0 %v145_v1  ;;  %v57_v3 = vld [vmem:[#allocation3] sm:$0xff]  ;;  %v58_v4 = vld [vmem:[#allocation3 + $0x8] sm:$0xff]  ;;  %vm76_vm1 = vcmask 261120   ;;  %v154_v10 = vld [vmem:[%s285_s2] ss:$0 sm:$0xff] }
   0xe   :  { %54 = vst.msk [vmem:[#allocation2 + $0x8] sm:$0xff] %vm52_vm0, %v239_v0  ;;  %v59_v5 = vpack.c.bf16 %v58_v4, %v57_v3  ;;  %vm112_vm2 = vcmask 781312   ;;  %s240_s26 = smov [#allocation8]   ;;  %s121_s30 = sshll.u32 %s286_s3, 4  ;;  %s122_s30 = int_to_ptr.hbm [resolvable:$true] %s121_s30 }
   0xf   :  { %s119_s27 = sshll.u32 %s240_s26, 4  ;;  %s120_s27 = int_to_ptr.vmem [resolvable:$true] %s119_s27 }
  0x11   :  { %87 = vmatpush.bf16.msra.mxu0 %v144_v2 }
  0x14   :  { %143 = vmatmul.msk.bf16.vlgmr.msra.gmra.mxu0 %vm76_vm1, %v59_v5  ;;  %v55_v6 = vld [vmem:[#allocation2] sm:$0xff] }
  0x15   :  { %v56_v9 = vld [vmem:[#allocation2 + $0x8] sm:$0xff] }
  0x91   :  { %v89_v7 = vpop.f32.mrf.mxu0 }
  0x92   :  { %v94_v8 = vadd.f32 %v89_v7, %v55_v6 }
  0x94   :  { %97 = vst.msk [vmem:[#allocation2] sm:$0xff] %vm52_vm0, %v94_v8 }
  0x99   :  { %v91_v11 = vpop.f32.mrf.mxu0 }
  0x9a   :  { %v95_v12 = vadd.f32 %v91_v11, %v56_v9 }
  0x9b   :  { %v102_v13 = vld [vmem:[#allocation2] sm:$0xff] }
  0x9c   :  { %98 = vst.msk [vmem:[#allocation2 + $0x8] sm:$0xff] %vm52_vm0, %v95_v12  ;;  %v108_v14 = vadd.f32 %v154_v10, %v102_v13 }
  0x9e   :  { %v110_v15 = vpack.c.bf16 %v108_v14, %v108_v14 }
  0xa0   :  { %113 = vst.msk [vmem:[#allocation8] sm:$0xf] %vm112_vm2, %v110_v15 }
  0xa3   :  { %v103_v16 = vld [vmem:[#allocation2 + $0x8] sm:$0xff] }
  0xa4   :  { %v109_v17 = vadd.f32 %v154_v10, %v103_v16 }
  0xa6   :  { %v111_v18 = vpack.c.bf16 %v109_v17, %v109_v17 }
  0xa8   :  { %114 = vst.msk [vmem:[#allocation8 + $0x4] sm:$0xf] %vm112_vm2, %v111_v18 }
  0xa9   :  { %127 = dma.vmem_to_hbm [thread:$0]  %s120_s27, 128, %s122_s30, [#allocation5], %s237_s24, %s237_s24, %s238_s25  }
  0xaa   :  { %231 = dma.done.wait [#allocation5], 128  }
  0xab   :  { %232 = vsyncadd [#allocation5], 4294967168 }
  0xac   :  { %132 = vsyncpa [#allocation4], 1 }
  0xad   :  { %133 = vsyncpa [#allocation7], 1 }
  0xae   :  { %134 = vsyncpa [#allocation5], 1 }

</bundles_post_ra>
